<compile_context>
chip_gen: v7x
topology: tpu7x:2x2x1
jax: 0.10.0
libtpu: 0.0.40
codegen_flags: <defaults>
</compile_context>

<pallas_src>
import functools

import jax
import jax.numpy as jnp
from jax.experimental import pallas as pl
from jax.experimental.pallas import tpu as pltpu


# ----------------------------- Pallas kernel ------------------------------- #

def _fcgp_kernel(x_ref, w1_ref, b1_ref, w2_ref, b2_ref, wh_ref, bh_ref,
                 out_ref, *, a_pad, log_std_min, log_std_max):
    """One batch tile of the MLP; weights stay resident across the grid."""
    x = x_ref[...]

    # input layer + relu
    h = jnp.dot(x, w1_ref[...], preferred_element_type=jnp.float32) + b1_ref[...]
    h = jnp.maximum(h, 0.0)

    # hidden layer + relu
    h = jnp.dot(h, w2_ref[...], preferred_element_type=jnp.float32) + b2_ref[...]
    h = jnp.maximum(h, 0.0)

    # fused heads: columns [0, a_pad) = mean, [a_pad, 2*a_pad) = log_std
    o = jnp.dot(h, wh_ref[...], preferred_element_type=jnp.float32) + bh_ref[...]

    # clamp only the log_std half; single lane-dense store of the whole slab
    col = jax.lax.broadcasted_iota(jnp.int32, o.shape, dimension=1)
    out_ref[...] = jnp.where(col >= a_pad,
                             jnp.clip(o, log_std_min, log_std_max),
                             o)


# ------------------------------- Helpers ------------------------------------ #

def _round_up(n, m):
    return ((n + m - 1) // m) * m


def _pad2(a, rows, cols):
    a = a.astype(jnp.float32)
    r, c = a.shape
    return jnp.pad(a, ((0, rows - r), (0, cols - c)))


# --------------------- One-time parameter preparation ------------------------ #

def prepare_fcgp_params(params):
    """Pad weights to TPU-friendly tiles and fuse the mean/log_std heads.

    Do this ONCE (not per forward call). Returns (padded_tensors, dims).
    Weights use the x @ W convention, i.e. shape [in, out].
    """
    (w1, b1), (w2, b2), (wm, bm), (ws, bs) = params
    Din, H1 = w1.shape
    H2 = w2.shape[1]
    A = wm.shape[1]

    Dp = _round_up(Din, 8)      # sublane alignment only; no 128-padding of x features
    H1p = _round_up(H1, 128)
    H2p = _round_up(H2, 128)
    Ap = _round_up(A, 128)

    w1_p = _pad2(w1, Dp, H1p)
    b1_p = _pad2(b1.reshape(1, -1), 1, H1p)
    w2_p = _pad2(w2, H1p, H2p)
    b2_p = _pad2(b2.reshape(1, -1), 1, H2p)

    # fused head weight/bias: [.., :Ap] -> mean, [.., Ap:] -> log_std
    wh_p = jnp.zeros((H2p, 2 * Ap), jnp.float32)
    wh_p = wh_p.at[:H2, :A].set(wm.astype(jnp.float32))
    wh_p = wh_p.at[:H2, Ap:Ap + A].set(ws.astype(jnp.float32))
    bh_p = jnp.zeros((1, 2 * Ap), jnp.float32)
    bh_p = bh_p.at[0, :A].set(bm.astype(jnp.float32))
    bh_p = bh_p.at[0, Ap:Ap + A].set(bs.astype(jnp.float32))

    dims = {"Din": Din, "Dp": Dp, "A": A, "Ap": Ap,
            "H1p": H1p, "H2p": H2p}
    return (w1_p, b1_p, w2_p, b2_p, wh_p, bh_p), dims


# ------------------------------- Forward ------------------------------------ #

def fcgp_forward(x, prepared, *, log_std_min=-20.0, log_std_max=2.0,
                 max_batch_tile=1024):
    """Pallas-backed FCGP.forward. x: [B, input_dim] float32.

    `prepared` comes from prepare_fcgp_params (padding hoisted out of the call).
    Returns (mean, log_std), each [B, action_dim] float32.
    """
    (w1_p, b1_p, w2_p, b2_p, wh_p, bh_p), dims = prepared
    B, Din = x.shape
    assert Din == dims["Din"], "input feature dim mismatch with prepared params"
    Dp, A, Ap = dims["Dp"], dims["A"], dims["Ap"]
    H1p, H2p = dims["H1p"], dims["H2p"]
    Np = 2 * Ap  # fused head output width (lane-dense, multiple of 128)

    # batch tiling: multiple of 8, capped so tiles fit v7x's smaller VMEM
    Bt = min(max_batch_tile, _round_up(B, 8))
    Bp = _round_up(B, Bt)
    n_tiles = Bp // Bt

    x_p = jnp.pad(x.astype(jnp.float32), ((0, Bp - B), (0, Dp - Din)))

    kernel = functools.partial(
        _fcgp_kernel, a_pad=Ap,
        log_std_min=float(log_std_min), log_std_max=float(log_std_max))

    out = pl.pallas_call(
        kernel,
        out_shape=jax.ShapeDtypeStruct((Bp, Np), jnp.float32),
        grid=(n_tiles,),
        in_specs=[
            pl.BlockSpec((Bt, Dp), lambda i: (i, 0)),      # x: tiled over batch
            pl.BlockSpec((Dp, H1p), lambda i: (0, 0)),     # w1: resident
            pl.BlockSpec((1, H1p), lambda i: (0, 0)),      # b1
            pl.BlockSpec((H1p, H2p), lambda i: (0, 0)),    # w2
            pl.BlockSpec((1, H2p), lambda i: (0, 0)),      # b2
            pl.BlockSpec((H2p, Np), lambda i: (0, 0)),     # fused head weight
            pl.BlockSpec((1, Np), lambda i: (0, 0)),       # fused head bias
        ],
        out_specs=pl.BlockSpec((Bt, Np), lambda i: (i, 0)),
        compiler_params=pltpu.CompilerParams(
            dimension_semantics=("parallel",),             # megacore on v7x
            vmem_limit_bytes=32 * 1024 * 1024,             # explicit, v7x-safe
        ),
    )(x_p, w1_p, b1_p, w2_p, b2_p, wh_p, bh_p)

    mean = out[:B, :A]
    log_std = out[:B, Ap:Ap + A]
    return mean, log_std


# --------------------------- Parameter init ---------------------------------- #

def init_fcgp_params(key, input_dim, hidden_dims, action_dim):
    """Mirrors layer_init: orthogonal(gain) weights, zero bias.

    Weights stored as [in, out] (x @ W convention).
    gain('relu') = sqrt(2), gain('tanh') = 5/3 (torch.nn.init.calculate_gain).
    """
    relu_gain = jnp.sqrt(2.0)
    tanh_gain = 5.0 / 3.0
    k1, k2, k3, k4 = jax.random.split(key, 4)

    ortho = jax.nn.initializers.orthogonal

    w1 = ortho(scale=relu_gain)(k1, (input_dim, hidden_dims[0]), jnp.float32)
    b1 = jnp.zeros((hidden_dims[0],), jnp.float32)

    w2 = ortho(scale=relu_gain)(k2, (hidden_dims[0], hidden_dims[1]), jnp.float32)
    b2 = jnp.zeros((hidden_dims[1],), jnp.float32)

    wm = ortho(scale=tanh_gain)(k3, (hidden_dims[1], action_dim), jnp.float32)
    bm = jnp.zeros((action_dim,), jnp.float32)

    ws = ortho(scale=tanh_gain)(k4, (hidden_dims[1], action_dim), jnp.float32)
    bs = jnp.zeros((action_dim,), jnp.float32)

    return ((w1, b1), (w2, b2), (wm, bm), (ws, bs))


# ------------------------------- Reference ----------------------------------- #

def fcgp_forward_ref(x, params, *, log_std_min=-20.0, log_std_max=2.0):
    (w1, b1), (w2, b2), (wm, bm), (ws, bs) = params
    h = jax.nn.relu(x @ w1 + b1)
    h = jax.nn.relu(h @ w2 + b2)
    mean = h @ wm + bm
    log_std = jnp.clip(h @ ws + bs, log_std_min, log_std_max)
    return mean, log_std


# --------------------------------- Main -------------------------------------- #

if __name__ == "__main__":
    key = jax.random.PRNGKey(0)
    k_params, k_x = jax.random.split(key)

    # Small shapes consistent with the module:
    #   input_dim=16, hidden_dims=(32, 32), action_bounds of length 2 -> action_dim=2
    B, input_dim, hidden_dims, action_dim = 2, 16, (32, 32), 2
    log_std_min, log_std_max = -20.0, 2.0

    params = init_fcgp_params(k_params, input_dim, hidden_dims, action_dim)
    prepared = prepare_fcgp_params(params)   # pad/fuse ONCE, outside the hot loop
    x = jax.random.normal(k_x, (B, input_dim), dtype=jnp.float32)

    mean, log_std = fcgp_forward(
        x, prepared, log_std_min=log_std_min, log_std_max=log_std_max
    )
    jax.block_until_ready((mean, log_std))

    mean_ref, log_std_ref = fcgp_forward_ref(
        x, params, log_std_min=log_std_min, log_std_max=log_std_max
    )

    assert mean.shape == (B, action_dim) and log_std.shape == (B, action_dim)
    assert jnp.allclose(mean, mean_ref, atol=1e-5, rtol=1e-5)
    assert jnp.allclose(log_std, log_std_ref, atol=1e-5, rtol=1e-5)

    print("KERNEL_OK")
</pallas_src>

<mosaic_0001>
module attributes {stable_mosaic.version = 11 : i64} {
  func.func @_fcgp_kernel(%arg0: i32, %arg1: memref<8x16xf32, #tpu.memory_space<vmem>>, %arg2: memref<16x128xf32, #tpu.memory_space<vmem>>, %arg3: memref<1x128xf32, #tpu.memory_space<vmem>>, %arg4: memref<128x128xf32, #tpu.memory_space<vmem>>, %arg5: memref<1x128xf32, #tpu.memory_space<vmem>>, %arg6: memref<128x256xf32, #tpu.memory_space<vmem>>, %arg7: memref<1x256xf32, #tpu.memory_space<vmem>>, %arg8: memref<8x256xf32, #tpu.memory_space<vmem>>) attributes {dimension_semantics = [#tpu.dimension_semantics<parallel>], iteration_bounds = array<i64: 1>, scalar_prefetch = 0 : i64, scratch_operands = 0 : i64, tpu.core_type = #tpu.core_type<tc>, window_params = [{transform_indices = @transform_0, window_bounds = array<i64: 8, 16>}, {pipeline_mode = #tpu.pipeline_mode<synchronous>, transform_indices = @transform_1, window_bounds = array<i64: 16, 128>}, {pipeline_mode = #tpu.pipeline_mode<synchronous>, transform_indices = @transform_2, window_bounds = array<i64: 1, 128>}, {pipeline_mode = #tpu.pipeline_mode<synchronous>, transform_indices = @transform_3, window_bounds = array<i64: 128, 128>}, {pipeline_mode = #tpu.pipeline_mode<synchronous>, transform_indices = @transform_4, window_bounds = array<i64: 1, 128>}, {pipeline_mode = #tpu.pipeline_mode<synchronous>, transform_indices = @transform_5, window_bounds = array<i64: 128, 256>}, {pipeline_mode = #tpu.pipeline_mode<synchronous>, transform_indices = @transform_6, window_bounds = array<i64: 1, 256>}, {transform_indices = @transform_7, window_bounds = array<i64: 8, 256>}]} {
    %c0 = arith.constant 0 : index
    %c0_0 = arith.constant 0 : index
    %0 = vector.load %arg1[%c0, %c0_0] : memref<8x16xf32, #tpu.memory_space<vmem>>, vector<8x16xf32>
    %c0_1 = arith.constant 0 : index
    %c0_2 = arith.constant 0 : index
    %1 = vector.load %arg2[%c0_1, %c0_2] : memref<16x128xf32, #tpu.memory_space<vmem>>, vector<16x128xf32>
    %cst = arith.constant dense<0.000000e+00> : vector<8x128xf32>
    %2 = tpu.matmul %0, %1, %cst {dimension_numbers = #tpu.dot_dimension_numbers<[1], [0], [0], [1], [0, 0, 1, 1], [], []>} : vector<8x16xf32>, vector<16x128xf32>, vector<8x128xf32> -> vector<8x128xf32>
    %c0_3 = arith.constant 0 : index
    %c0_4 = arith.constant 0 : index
    %3 = vector.load %arg3[%c0_3, %c0_4] : memref<1x128xf32, #tpu.memory_space<vmem>>, vector<1x128xf32>
    %4 = vector.broadcast %3 : vector<1x128xf32> to vector<8x128xf32>
    %5 = arith.addf %2, %4 : vector<8x128xf32>
    %cst_5 = arith.constant 0.000000e+00 : f32
    %6 = vector.broadcast %cst_5 : f32 to vector<8x128xf32>
    %7 = arith.maximumf %5, %6 : vector<8x128xf32>
    %c0_6 = arith.constant 0 : index
    %c0_7 = arith.constant 0 : index
    %8 = vector.load %arg4[%c0_6, %c0_7] : memref<128x128xf32, #tpu.memory_space<vmem>>, vector<128x128xf32>
    %cst_8 = arith.constant dense<0.000000e+00> : vector<8x128xf32>
    %9 = tpu.matmul %7, %8, %cst_8 {dimension_numbers = #tpu.dot_dimension_numbers<[1], [0], [0], [1], [0, 0, 1, 1], [], []>} : vector<8x128xf32>, vector<128x128xf32>, vector<8x128xf32> -> vector<8x128xf32>
    %c0_9 = arith.constant 0 : index
    %c0_10 = arith.constant 0 : index
    %10 = vector.load %arg5[%c0_9, %c0_10] : memref<1x128xf32, #tpu.memory_space<vmem>>, vector<1x128xf32>
    %11 = vector.broadcast %10 : vector<1x128xf32> to vector<8x128xf32>
    %12 = arith.addf %9, %11 : vector<8x128xf32>
    %cst_11 = arith.constant 0.000000e+00 : f32
    %13 = vector.broadcast %cst_11 : f32 to vector<8x128xf32>
    %14 = arith.maximumf %12, %13 : vector<8x128xf32>
    %c0_12 = arith.constant 0 : index
    %c0_13 = arith.constant 0 : index
    %15 = vector.load %arg6[%c0_12, %c0_13] : memref<128x256xf32, #tpu.memory_space<vmem>>, vector<128x256xf32>
    %cst_14 = arith.constant dense<0.000000e+00> : vector<8x256xf32>
    %16 = tpu.matmul %14, %15, %cst_14 {dimension_numbers = #tpu.dot_dimension_numbers<[1], [0], [0], [1], [0, 0, 1, 1], [], []>} : vector<8x128xf32>, vector<128x256xf32>, vector<8x256xf32> -> vector<8x256xf32>
    %c0_15 = arith.constant 0 : index
    %c0_16 = arith.constant 0 : index
    %17 = vector.load %arg7[%c0_15, %c0_16] : memref<1x256xf32, #tpu.memory_space<vmem>>, vector<1x256xf32>
    %18 = vector.broadcast %17 : vector<1x256xf32> to vector<8x256xf32>
    %19 = arith.addf %16, %18 : vector<8x256xf32>
    %20 = tpu.iota {dimensions = array<i32: 1>} : vector<8x256xi32>
    %c128_i32 = arith.constant 128 : i32
    %21 = vector.broadcast %c128_i32 : i32 to vector<8x256xi32>
    %22 = arith.cmpi sge, %20, %21 : vector<8x256xi32>
    %cst_17 = arith.constant -2.000000e+01 : f32
    %cst_18 = arith.constant 2.000000e+00 : f32
    %23 = vector.broadcast %cst_17 : f32 to vector<8x256xf32>
    %24 = arith.maximumf %23, %19 : vector<8x256xf32>
    %25 = vector.broadcast %cst_18 : f32 to vector<8x256xf32>
    %26 = arith.minimumf %25, %24 : vector<8x256xf32>
    %27 = arith.select %22, %26, %19 : vector<8x256xi1>, vector<8x256xf32>
    %c0_19 = arith.constant 0 : index
    %c0_20 = arith.constant 0 : index
    %28 = vector.load %arg8[%c0_19, %c0_20] : memref<8x256xf32, #tpu.memory_space<vmem>>, vector<8x256xf32>
    tpu.vector_store %arg8[%c0_19, %c0_20], %27 {strides = array<i32>} : memref<8x256xf32, #tpu.memory_space<vmem>>, vector<8x256xf32>,
    return
  }
  func.func @transform_0(%arg0: i32) -> (i32, i32) {
    %c0_i32 = arith.constant 0 : i32
    %c0_i32_0 = arith.constant 0 : i32
    return %arg0, %c0_i32 : i32, i32
  }
  func.func @transform_1(%arg0: i32) -> (i32, i32) {
    %c0_i32 = arith.constant 0 : i32
    %c0_i32_0 = arith.constant 0 : i32
    %c0_i32_1 = arith.constant 0 : i32
    return %c0_i32, %c0_i32_0 : i32, i32
  }
  func.func @transform_2(%arg0: i32) -> (i32, i32) {
    %c0_i32 = arith.constant 0 : i32
    %c0_i32_0 = arith.constant 0 : i32
    %c0_i32_1 = arith.constant 0 : i32
    return %c0_i32, %c0_i32_0 : i32, i32
  }
  func.func @transform_3(%arg0: i32) -> (i32, i32) {
    %c0_i32 = arith.constant 0 : i32
    %c0_i32_0 = arith.constant 0 : i32
    %c0_i32_1 = arith.constant 0 : i32
    return %c0_i32, %c0_i32_0 : i32, i32
  }
  func.func @transform_4(%arg0: i32) -> (i32, i32) {
    %c0_i32 = arith.constant 0 : i32
    %c0_i32_0 = arith.constant 0 : i32
    %c0_i32_1 = arith.constant 0 : i32
    return %c0_i32, %c0_i32_0 : i32, i32
  }
  func.func @transform_5(%arg0: i32) -> (i32, i32) {
    %c0_i32 = arith.constant 0 : i32
    %c0_i32_0 = arith.constant 0 : i32
    %c0_i32_1 = arith.constant 0 : i32
    return %c0_i32, %c0_i32_0 : i32, i32
  }
  func.func @transform_6(%arg0: i32) -> (i32, i32) {
    %c0_i32 = arith.constant 0 : i32
    %c0_i32_0 = arith.constant 0 : i32
    %c0_i32_1 = arith.constant 0 : i32
    return %c0_i32, %c0_i32_0 : i32, i32
  }
  func.func @transform_7(%arg0: i32) -> (i32, i32) {
    %c0_i32 = arith.constant 0 : i32
    %c0_i32_0 = arith.constant 0 : i32
    return %arg0, %c0_i32 : i32, i32
  }
}

</mosaic_0001>

<bundles_post_ra>
// kernel: tpu_custom_call.1
= control target key start
LH: loop header
LB: loop body
LE: loop exit
PB: predicated region body
PF: predicated region fallthrough
CT: control target
= control target key end

     0   :  { %12 = vsyncpa [#allocation3], 0  ;;  %s785_s0 = inlined_call_operand.hbm [shape: f32[8,16], index: 0, kind: input, shape index: {}]   ;;  %s786_s1 = inlined_call_operand.hbm [shape: f32[16,128], index: 1, kind: input, shape index: {}]   ;;  %s787_s2 = inlined_call_operand.vmem [shape: f32[1,128], index: 2, kind: input, shape index: {}]   ;;  %s788_s3 = inlined_call_operand.hbm [shape: f32[128,128], index: 3, kind: input, shape index: {}]   ;;  %s789_s4 = inlined_call_operand.vmem [shape: f32[1,128], index: 4, kind: input, shape index: {}]   ;;  %s790_s5 = inlined_call_operand.hbm [shape: f32[128,256], index: 5, kind: input, shape index: {}]   ;;  %s791_s6 = inlined_call_operand.vmem [shape: f32[1,256], index: 6, kind: input, shape index: {}]   ;;  %s792_s7 = inlined_call_operand.hbm [shape: f32[8,256], index: 7, kind: output, shape index: {}]  }
   0x1   :  { %13 = vsyncpa [#allocation6], 0 }
   0x2   :  { %14 = vsyncpa [#allocation9], 0 }
   0x3   :  { %15 = vsyncpa [#allocation4], 0  ;;  %s658_s24 = smov [#allocation5]   ;;  %s540_s28 = scalar_lea.hbm %s786_s1, 256 }
   0x4   :  { %s31_s25 = sshll.u32 %s658_s24, 4  ;;  %p541_p0 = scmp.ne.s32.totalorder %s786_s1, %s540_s28  ;;  %s32_s25 = int_to_ptr.vmem [resolvable:$true] %s31_s25 }
   0x5   :  { %p544_p1 = scmp.lt.u32.totalorder %s540_s28, %s786_s1 }
   0x7   :  { %p546_p2 = pnand %p544_p1, %p541_p0 }
   0x9   :  { %549 = shalt.err (!%p546_p2)
}
   0xa   :  { %s550_s10 = scalar_lea.vmem %s32_s25, 256  ;;  %p555_p4 = scmp.lt.s32.totalorder %s32_s25, %s32_s25 }
   0xb   :  { %p551_p3 = scmp.ne.s32.totalorder %s32_s25, %s550_s10  ;;  %p556_p5 = scmp.lt.s32.totalorder %s550_s10, %s550_s10 }
   0xd   :  { %p557_p6 = por %p556_p5, %p555_p4 }
   0xf   :  { %p558_p7 = pnand %p557_p6, %p551_p3 }
  0x11   :  { %561 = shalt.err (!%p558_p7)
}
  0x12   :  { %s659_s11 = smov 128   ;;  %s660_s12 = smov 8  }
  0x13   :  { %37 = dma.hbm_to_vmem [thread:$0]  %s786_s1, 256, %s32_s25, [#allocation6], %s659_s11, %s659_s11, %s660_s12  }
  0x14   :  { %s661_s15 = smov [#allocation2]   ;;  %s662_s17 = smov [#allocation7]  }
  0x15   :  { %s22_s16 = sshll.u32 %s661_s15, 4  ;;  %s45_s18 = sshll.u32 %s662_s17, 4  ;;  %s23_s16 = int_to_ptr.vmem [resolvable:$true] %s22_s16  ;;  %s46_s18 = int_to_ptr.vmem [resolvable:$true] %s45_s18 }
  0x16   :  { %s562_s21 = scalar_lea.hbm %s785_s0, 128 }
  0x17   :  { %p563_p8 = scmp.ne.s32.totalorder %s785_s0, %s562_s21  ;;  %p566_p9 = scmp.lt.u32.totalorder %s562_s21, %s785_s0 }
  0x19   :  { %p568_p10 = pnand %p566_p9, %p563_p8 }
  0x1b   :  { %571 = shalt.err (!%p568_p10)
}
  0x1c   :  { %s572_s1 = scalar_lea.vmem %s23_s16, 128  ;;  %p577_p12 = scmp.lt.s32.totalorder %s23_s16, %s23_s16 }
  0x1d   :  { %p573_p11 = scmp.ne.s32.totalorder %s23_s16, %s572_s1  ;;  %p578_p13 = scmp.lt.s32.totalorder %s572_s1, %s572_s1 }
  0x1f   :  { %p579_p0 = por %p578_p13, %p577_p12 }
  0x21   :  { %p580_p1 = pnand %p579_p0, %p573_p11 }
  0x23   :  { %583 = shalt.err (!%p580_p1)
}
  0x24   :  { %25 = dma.hbm_to_vmem [thread:$0]  %s785_s0, 128, %s23_s16, [#allocation3]  }
  0x25   :  { %s584_s30 = scalar_lea.hbm %s788_s3, 2048 }
  0x26   :  { %p585_p2 = scmp.ne.s32.totalorder %s788_s3, %s584_s30  ;;  %p588_p3 = scmp.lt.u32.totalorder %s584_s30, %s788_s3 }
  0x28   :  { %p590_p4 = pnand %p588_p3, %p585_p2 }
  0x2a   :  { %593 = shalt.err (!%p590_p4)
}
  0x2b   :  { %s594_s14 = scalar_lea.vmem %s46_s18, 2048  ;;  %p599_p6 = scmp.lt.s32.totalorder %s46_s18, %s46_s18 }
  0x2c   :  { %p595_p5 = scmp.ne.s32.totalorder %s46_s18, %s594_s14  ;;  %p600_p7 = scmp.lt.s32.totalorder %s594_s14, %s594_s14 }
  0x2e   :  { %p601_p8 = por %p600_p7, %p599_p6 }
  0x30   :  { %p602_p9 = pnand %p601_p8, %p595_p5 }
  0x32   :  { %605 = shalt.err (!%p602_p9)
}
  0x33   :  { %51 = dma.hbm_to_vmem [thread:$0]  %s788_s3, 2048, %s46_s18, [#allocation6], %s659_s11, %s659_s11, %s660_s12  }
  0x34   :  { %s663_s16 = smov [#allocation8]   ;;  %s606_s21 = scalar_lea.hbm %s790_s5, 4096 }
  0x35   :  { %s59_s17 = sshll.u32 %s663_s16, 4  ;;  %p607_p10 = scmp.ne.s32.totalorder %s790_s5, %s606_s21  ;;  %s60_s17 = int_to_ptr.vmem [resolvable:$true] %s59_s17 }
  0x36   :  { %p610_p11 = scmp.lt.u32.totalorder %s606_s21, %s790_s5 }
  0x38   :  { %p612_p12 = pnand %p610_p11, %p607_p10 }
  0x3a   :  { %615 = shalt.err (!%p612_p12)
}
  0x3b   :  { %s616_s1 = scalar_lea.vmem %s60_s17, 4096  ;;  %p621_p0 = scmp.lt.s32.totalorder %s60_s17, %s60_s17 }
  0x3c   :  { %p617_p13 = scmp.ne.s32.totalorder %s60_s17, %s616_s1  ;;  %p622_p1 = scmp.lt.s32.totalorder %s616_s1, %s616_s1 }
  0x3e   :  { %p623_p2 = por %p622_p1, %p621_p0 }
  0x40   :  { %p624_p3 = pnand %p623_p2, %p617_p13 }
  0x42   :  { %627 = shalt.err (!%p624_p3)
}
  0x43   :  { %s664_s3 = smov 256   ;;  %s665_s11 = smov 16  }
  0x44   :  { %65 = dma.hbm_to_vmem [thread:$0]  %s790_s5, 4096, %s60_s17, [#allocation9], %s664_s3, %s664_s3, %s665_s11  }
  0x45   :  { %650 = dma.done.wait [#allocation3], 128  }
  0x46   :  { %651 = vsyncadd [#allocation3], 4294967168 }
  0x47   :  { %652 = dma.done.wait [#allocation6], 2304  }
  0x48   :  { %653 = vsyncadd [#allocation6], 4294964992 }
  0x49   :  { %654 = dma.done.wait [#allocation9], 4096  }
  0x4a   :  { %655 = vsyncadd [#allocation9], 4294963200  ;;  %v666_v0 = vmov 0.0|0.0   ;;  %vm667_vm0 = vmmov 0   ;;  %v668_v1 = vmov 0.0   ;;  %v81_v2 = vld [vmem:[#allocation5] sm:$0xff] }
  0x4b   :  { %469 = vmatprep.subr.bf16.mxu0 %v666_v0  ;;  %431 = vmatprep.mubr.msk.f32.mxu0 %vm667_vm0, %v668_v1  ;;  %v82_v3 = vld [vmem:[#allocation5 + $0x8] sm:$0xff]  ;;  %v165_v5 = vld [vmem:[#allocation7] sm:$0xff]  ;;  %v166_v6 = vld [vmem:[#allocation7 + $0x8] sm:$0xff]  ;;  %vm90_vm1 = vcmask 130048  }
  0x4c   :  { %472 = vmatprep.subr.bf16.mxu1 %v666_v0  ;;  %466 = vmatprep.mubr.msk.f32.mxu1 %vm667_vm0, %v668_v1  ;;  %v470_v4 = vpack.c.bf16 %v82_v3, %v81_v2  ;;  %v167_v7 = vld [vmem:[#allocation7 + $0x10] sm:$0xff]  ;;  %v473_v8 = vpack.c.bf16 %v166_v6, %v165_v5  ;;  %v168_v9 = vld [vmem:[#allocation7 + $0x18] sm:$0xff]  ;;  %v80_v10 = vld [vmem:[#allocation2] sm:$0xff] }
  0x4d   :  { %v476_v11 = vpack.c.bf16 %v168_v9, %v167_v7  ;;  %v169_v12 = vld [vmem:[#allocation7 + $0x20] sm:$0xff]  ;;  %v170_v13 = vld [vmem:[#allocation7 + $0x28] sm:$0xff]  ;;  %v171_v15 = vld [vmem:[#allocation7 + $0x30] sm:$0xff] }
  0x4e   :  { %471 = vmatpush3.bf16.msra.mxu0 %v470_v4  ;;  %474 = vmatpush3.bf16.msra.mxu1 %v473_v8  ;;  %v479_v14 = vpack.c.bf16 %v170_v13, %v169_v12  ;;  %v172_v16 = vld [vmem:[#allocation7 + $0x38] sm:$0xff]  ;;  %v173_v18 = vld [vmem:[#allocation7 + $0x40] sm:$0xff]  ;;  %v174_v19 = vld [vmem:[#allocation7 + $0x48] sm:$0xff] }
  0x4f   :  { %475 = vmatprep.subr.bf16.mxu1 %v666_v0  ;;  %v482_v17 = vpack.c.bf16 %v172_v16, %v171_v15  ;;  %v485_v20 = vpack.c.bf16 %v174_v19, %v173_v18  ;;  %v175_v21 = vld [vmem:[#allocation7 + $0x50] sm:$0xff]  ;;  %v176_v22 = vld [vmem:[#allocation7 + $0x58] sm:$0xff]  ;;  %v177_v24 = vld [vmem:[#allocation7 + $0x60] sm:$0xff] }
  0x50   :  { %v488_v23 = vpack.c.bf16 %v176_v22, %v175_v21  ;;  %v178_v25 = vld [vmem:[#allocation7 + $0x68] sm:$0xff]  ;;  %v179_v27 = vld [vmem:[#allocation7 + $0x70] sm:$0xff]  ;;  %v180_v28 = vld [vmem:[#allocation7 + $0x78] sm:$0xff] }
  0x51   :  { %432 = vmatmul.mubr.msk.f32.vlgmr.msra.gmra.mrb[0].mxu0 %vm90_vm1, %v80_v10  ;;  %v491_v26 = vpack.c.bf16 %v178_v25, %v177_v24  ;;  %v494_v29 = vpack.c.bf16 %v180_v28, %v179_v27  ;;  %v260_v30 = vld [vmem:[#allocation8 + $0x8] sm:$0xff]  ;;  %v262_v31 = vld [vmem:[#allocation8 + $0x18] sm:$0xff]  ;;  %v259_v32 = vld [vmem:[#allocation8] sm:$0xff]  ;;  %v293_v24 = vlaneseq }
  0x52   :  { %367 = vmatprep.mubr.f32.mxu0 %v668_v1  ;;  %477 = vmatpush3.bf16.msra.mxu1 %v476_v11  ;;  %v496_v33 = vpack.c.bf16 %v262_v31, %v260_v30  ;;  %v261_v34 = vld [vmem:[#allocation8 + $0x10] sm:$0xff]  ;;  %v264_v35 = vld [vmem:[#allocation8 + $0x28] sm:$0xff]  ;;  %v266_v36 = vld [vmem:[#allocation8 + $0x38] sm:$0xff] }
  0x53   :  { %478 = vmatprep.subr.bf16.mxu1 %v666_v0  ;;  %v498_v37 = vpack.c.bf16 %v261_v34, %v259_v32  ;;  %v500_v38 = vpack.c.bf16 %v266_v36, %v264_v35  ;;  %v263_v39 = vld [vmem:[#allocation8 + $0x20] sm:$0xff]  ;;  %v265_v40 = vld [vmem:[#allocation8 + $0x30] sm:$0xff]  ;;  %v268_v41 = vld [vmem:[#allocation8 + $0x48] sm:$0xff]  ;;  %v294_v25 = vshrl.u32 %v293_v24, 7 }
  0x54   :  { %497 = vmatprep.subr.bf16.mxu0 %v496_v33  ;;  %v270_v42 = vld [vmem:[#allocation8 + $0x58] sm:$0xff]  ;;  %v502_v43 = vpack.c.bf16 %v265_v40, %v263_v39  ;;  %v267_v45 = vld [vmem:[#allocation8 + $0x40] sm:$0xff]  ;;  %v269_v46 = vld [vmem:[#allocation8 + $0x50] sm:$0xff] }
  0x55   :  { %499 = vmatpush1.bf16.msra.mxu0 %v498_v37  ;;  %v504_v44 = vpack.c.bf16 %v270_v42, %v268_v41  ;;  %v272_v47 = vld [vmem:[#allocation8 + $0x68] sm:$0xff]  ;;  %v274_v48 = vld [vmem:[#allocation8 + $0x78] sm:$0xff]  ;;  %v506_v49 = vpack.c.bf16 %v269_v46, %v267_v45  ;;  %v271_v51 = vld [vmem:[#allocation8 + $0x60] sm:$0xff]  ;;  %v299_v28 = vsub.s32 1, %v294_v25 }
  0x56   :  { %480 = vmatpush3.bf16.msra.mxu1 %v479_v14  ;;  %501 = vmatprep.subr.bf16.mxu0 %v500_v38  ;;  %v508_v50 = vpack.c.bf16 %v274_v48, %v272_v47  ;;  %v273_v52 = vld [vmem:[#allocation8 + $0x70] sm:$0xff]  ;;  %v276_v53 = vld [vmem:[#allocation8 + $0x88] sm:$0xff]  ;;  %v278_v54 = vld [vmem:[#allocation8 + $0x98] sm:$0xff] }
  0x57   :  { %481 = vmatprep.subr.bf16.mxu1 %v666_v0  ;;  %v510_v55 = vpack.c.bf16 %v273_v52, %v271_v51  ;;  %v512_v56 = vpack.c.bf16 %v278_v54, %v276_v53  ;;  %v275_v57 = vld [vmem:[#allocation8 + $0x80] sm:$0xff]  ;;  %v277_v58 = vld [vmem:[#allocation8 + $0x90] sm:$0xff]  ;;  %v280_v59 = vld [vmem:[#allocation8 + $0xa8] sm:$0xff] }
  0x58   :  { %v282_v60 = vld [vmem:[#allocation8 + $0xb8] sm:$0xff]  ;;  %v514_v61 = vpack.c.bf16 %v277_v58, %v275_v57  ;;  %v279_v63 = vld [vmem:[#allocation8 + $0xa0] sm:$0xff]  ;;  %v284_v1 = vld [vmem:[#allocation8 + $0xc8] sm:$0xff] }
  0x59   :  { %503 = vmatpush1.bf16.msra.mxu0 %v502_v43  ;;  %v516_v62 = vpack.c.bf16 %v282_v60, %v280_v59  ;;  %v286_v2 = vld [vmem:[#allocation8 + $0xd8] sm:$0xff]  ;;  %v283_v5 = vld [vmem:[#allocation8 + $0xc0] sm:$0xff]  ;;  %v285_v6 = vld [vmem:[#allocation8 + $0xd0] sm:$0xff] }
  0x5a   :  { %483 = vmatpush3.bf16.msra.mxu1 %v482_v17  ;;  %505 = vmatprep.subr.bf16.mxu0 %v504_v44  ;;  %v520_v4 = vpack.c.bf16 %v286_v2, %v284_v1  ;;  %v522_v7 = vpack.c.bf16 %v285_v6, %v283_v5  ;;  %v404_v8 = vld [vmem:[%s787_s2] ss:$0 sm:$0xff]  ;;  %v290_v14 = vld [vmem:[#allocation8 + $0xf8] sm:$0xff]  ;;  %v287_v16 = vld [vmem:[#allocation8 + $0xe0] sm:$0xff] }
  0x5b   :  { %484 = vmatprep.subr.bf16.mxu1 %v666_v0  ;;  %v288_v13 = vld [vmem:[#allocation8 + $0xe8] sm:$0xff]  ;;  %v289_v17 = vld [vmem:[#allocation8 + $0xf0] sm:$0xff] }
  0x5c   :  { %v524_v15 = vpack.c.bf16 %v290_v14, %v288_v13  ;;  %v526_v18 = vpack.c.bf16 %v289_v17, %v287_v16  ;;  %v406_v19 = vld [vmem:[%s789_s4] ss:$0 sm:$0xff]  ;;  %s669_s4 = smov [#allocation10]  }
  0x5d   :  { %507 = vmatpush1.bf16.msra.mxu0 %v506_v49  ;;  %v291_v27 = vld [vmem:[%s791_s6] sm:$0x3]  ;;  %s393_s30 = sshll.u32 %s669_s4, 4  ;;  %s394_s30 = int_to_ptr.vmem [resolvable:$true] %s393_s30 }
  0x5e   :  { %486 = vmatpush3.bf16.msra.mxu1 %v485_v20  ;;  %509 = vmatprep.subr.bf16.mxu0 %v508_v50  ;;  %v300_v30 = vrot.slane %v291_v27, %v299_v28  ;;  %s628_s8 = scalar_lea.vmem %s394_s30, 256  ;;  %p633_p5 = scmp.lt.s32.totalorder %s394_s30, %s394_s30 }
  0x5f   :  { %487 = vmatprep.subr.bf16.mxu1 %v666_v0  ;;  %p629_p4 = scmp.ne.s32.totalorder %s394_s30, %s628_s8  ;;  %p634_p6 = scmp.lt.s32.totalorder %s628_s8, %s628_s8 }
  0x61   :  { %511 = vmatpush1.bf16.msra.mxu0 %v510_v55  ;;  %p635_p7 = por %p634_p6, %p633_p5 }
  0x62   :  { %489 = vmatpush3.bf16.msra.mxu1 %v488_v23  ;;  %513 = vmatprep.subr.bf16.mxu0 %v512_v56 }
  0x63   :  { %490 = vmatprep.subr.bf16.mxu1 %v666_v0  ;;  %p636_p8 = pnand %p635_p7, %p629_p4 }
  0x65   :  { %515 = vmatpush1.bf16.msra.mxu0 %v514_v61 }
  0x66   :  { %492 = vmatpush3.bf16.msra.mxu1 %v491_v26  ;;  %517 = vmatprep.subr.bf16.mxu0 %v516_v62  ;;  %v295_v26 = vsub.s32 0, %v294_v25 }
  0x67   :  { %493 = vmatprep.subr.bf16.mxu1 %v666_v0  ;;  %v281_v0 = vld [vmem:[#allocation8 + $0xb0] sm:$0xff] }
  0x68   :  { %v518_v3 = vpack.c.bf16 %v281_v0, %v279_v63 }
  0x6a   :  { %495 = vmatpush3.bf16.msra.mxu1 %v494_v29  ;;  %519 = vmatpush1.bf16.msra.mxu0 %v518_v3  ;;  %v296_v29 = vrot.slane %v291_v27, %v295_v26 }
  0x6b   :  { %521 = vmatprep.subr.bf16.mxu0 %v520_v4 }
  0x6e   :  { %523 = vmatpush1.bf16.msra.mxu0 %v522_v7 }
  0x6f   :  { %525 = vmatprep.subr.bf16.mxu0 %v524_v15 }
  0x72   :  { %527 = vmatpush1.bf16.msra.mxu0 %v526_v18 }
 0x124   :  { %v160_v9 = vpop.f32.mrb[0].mxu0 }
 0x125   :  { %v161_v10 = vadd.f32 %v404_v8, %v160_v9  ;;  %v433_v11 = vpop.f32.mrb[1].mxu0 }
 0x127   :  { %v164_v12 = vmax.f32 %v161_v10, 0.0 }
 0x129   :  { %467 = vmatmul.mubr.f32.vlgmr.msra.gmra.mrb[0].mxu1 %v164_v12 }
 0x1fc   :  { %v254_v20 = vpop.f32.mrb[0].mxu1 }
 0x1fd   :  { %v255_v21 = vadd.f32 %v406_v19, %v254_v20  ;;  %v468_v22 = vpop.f32.mrb[1].mxu1 }
 0x1ff   :  { %v258_v23 = vmax.f32 %v255_v21, 0.0 }
 0x201   :  { %368 = vmatmul.mubr.f32.vlgmr.msra.gmra.mrb[2].mxu0 %v258_v23 }
 0x2d4   :  { %v369_v31 = vpop.f32.mrb[2].mxu0 }
 0x2d5   :  { %v370_v32 = vadd.f32 %v369_v31, %v296_v29  ;;  %v371_v33 = vpop.f32.mrb[3].mxu0 }
 0x2d6   :  { %v372_v34 = vadd.f32 %v371_v33, %v300_v30 }
 0x2d7   :  { %385 = vst [vmem:[#allocation10] sm:$0xff] %v370_v32 }
 0x2d8   :  { %v380_v35 = vmax.f32 %v372_v34, -20.0 }
 0x2da   :  { %v382_v36 = vmin.f32 %v380_v35, 2.0 }
 0x2dc   :  { %386 = vst [vmem:[#allocation10 + $0x8] sm:$0xff] %v382_v36 }
 0x2dd   :  { %639 = shalt.err (!%p636_p8)
}
 0x2de   :  { %s640_s10 = scalar_lea.hbm %s792_s7, 256 }
 0x2df   :  { %p641_p9 = scmp.ne.s32.totalorder %s792_s7, %s640_s10  ;;  %p644_p10 = scmp.lt.u32.totalorder %s640_s10, %s792_s7 }
 0x2e1   :  { %p646_p11 = pnand %p644_p10, %p641_p9 }
 0x2e3   :  { %649 = shalt.err (!%p646_p11)
}
 0x2e4   :  { %396 = dma.vmem_to_hbm [thread:$0]  %s394_s30, 256, %s792_s7, [#allocation4]  }
 0x2e5   :  { %656 = dma.done.wait [#allocation4], 256  }
 0x2e6   :  { %657 = vsyncadd [#allocation4], 4294967040 }
 0x2e7   :  { %400 = vsyncpa [#allocation3], 1 }
 0x2e8   :  { %401 = vsyncpa [#allocation6], 1 }
 0x2e9   :  { %402 = vsyncpa [#allocation9], 1 }
 0x2ea   :  { %403 = vsyncpa [#allocation4], 1 }

</bundles_post_ra>
